<compile_context>
chip_gen: v6e
topology: v6e:2x2x1
jax: 0.10.0
libtpu: 0.0.40
codegen_flags: <defaults>
</compile_context>

<pallas_src>
import jax
import jax.numpy as jnp
from jax import lax
from jax.experimental import pallas as pl
from jax.experimental.pallas import tpu as pltpu

# ---- small, module-consistent configuration --------------------------------
B = 2            # batch
FEAT = 12        # feature_len
SEQ = 15         # max_seq_length
Z = 32           # z_size   (small instead of default 200)
KS = (2, 3, 4)   # encoder_kernel_sizes
L3 = SEQ + len(KS) - sum(KS)     # conv output length after the 3 convs = 9
KFLAT = FEAT * L3                # fc_0 fan-in = 108
BN_EPS = 1e-5

# packed conv/BN parameter blob: rows 0..3 = conv taps (zero padded), then bias / gamma / beta
_ROW_BIAS, _ROW_GAMMA, _ROW_BETA = 4, 5, 6
_CONVP_ROWS = 7


# ============================== ENCODER KERNEL ==============================
def encoder_kernel(x_ref, convp_ref, w0_ref, wmv_ref, mu_ref, var_ref, flat_ref):
    a = x_ref[...]                       # (B, SEQ, FEAT): time on sublanes, features on lanes
    convp = convp_ref[...]               # (3, _CONVP_ROWS, FEAT)

    def prow(i, r):                      # per-channel parameter row, broadcastable (1, 1, FEAT)
        return convp[i:i + 1, r:r + 1, :]

    def conv_bn_relu(a, i, k):
        lout = a.shape[1] - k + 1
        # depthwise (groups=FEAT) Conv1d over time: static sublane-offset slices * per-channel taps
        acc = a[:, 0:lout, :] * prow(i, 0)
        for j in range(1, k):
            acc = acc + a[:, j:j + lout, :] * prow(i, j)
        acc = acc + prow(i, _ROW_BIAS)
        # BatchNorm1d, training mode: per-channel biased stats over (batch, time), single reduce pass
        inv_n = 1.0 / (B * lout)
        mean = jnp.sum(acc, axis=(0, 1), keepdims=True) * inv_n
        var = jnp.sum(acc * acc, axis=(0, 1), keepdims=True) * inv_n - mean * mean
        scale = prow(i, _ROW_GAMMA) * lax.rsqrt(var + BN_EPS)
        y = (acc - mean) * scale + prow(i, _ROW_BETA)
        return jnp.maximum(y, 0.0)       # ReLU

    a = conv_bn_relu(a, 0, KS[0])        # (B, 14, FEAT)
    a = conv_bn_relu(a, 1, KS[1])        # (B, 12, FEAT)
    a = conv_bn_relu(a, 2, KS[2])        # (B, L3, FEAT)

    # Flatten (time, feature) onto the lane axis through the VMEM scratch so fc_0 is a single
    # K=108 MXU push instead of 12 tiny K=9 dots.
    for t in range(L3):
        flat_ref[:, t * FEAT:(t + 1) * FEAT] = a[:, t, :]
    aflat = flat_ref[...]                # (B, KFLAT)

    # fc_0 (weight rows pre-permuted in the wrapper to match the kernel's time-major flatten)
    w0b = w0_ref[...]                    # (KFLAT + 1, Z): rows 0..KFLAT-1 weight, last row bias
    h = jnp.dot(aflat, w0b[0:KFLAT, :], preferred_element_type=jnp.float32) + w0b[KFLAT:, :]

    # fc_mu | fc_var fused into one dot, then split by lane slices
    wmv = wmv_ref[...]                   # (Z + 1, 2Z): [W_mu^T | W_var^T] on top, [b_mu | b_var] last
    mv = jnp.dot(h, wmv[0:Z, :], preferred_element_type=jnp.float32) + wmv[Z:, :]
    mu_ref[...] = mv[:, 0:Z]
    var_ref[...] = mv[:, Z:2 * Z]


# ================================ WRAPPER ===================================
_VMEM = pl.BlockSpec(memory_space=pltpu.MemorySpace.VMEM)


def encoder_forward(x, convp, w0b, wmv):
    """x: (B, SEQ, FEAT) float32 (native PyTorch layout); packed params from pack_params()."""
    mu, var = pl.pallas_call(
        encoder_kernel,
        out_shape=(jax.ShapeDtypeStruct((B, Z), jnp.float32),
                   jax.ShapeDtypeStruct((B, Z), jnp.float32)),
        in_specs=[_VMEM, _VMEM, _VMEM, _VMEM],
        out_specs=(_VMEM, _VMEM),
        scratch_shapes=[pltpu.VMEM((B, KFLAT), jnp.float32)],
    )(x, convp, w0b, wmv)
    return mu, var


def init_params(key):
    """Parameters in their native PyTorch layouts."""
    ks = jax.random.split(key, 12)
    r = lambda i, shape, s=0.1: (s * jax.random.normal(ks[i], shape)).astype(jnp.float32)
    p = {}
    for i, k in enumerate(KS):
        p[f"conv{i}_w"] = r(2 * i, (FEAT, 1, k))        # nn.Conv1d(groups=FEAT).weight
        p[f"conv{i}_b"] = r(2 * i + 1, (FEAT,))         # nn.Conv1d.bias
        p[f"bn{i}_g"] = jnp.ones((FEAT,), jnp.float32)  # nn.BatchNorm1d.weight
        p[f"bn{i}_b"] = jnp.zeros((FEAT,), jnp.float32)  # nn.BatchNorm1d.bias
    p["fc0_w"] = r(6, (Z, KFLAT))                        # nn.Linear(FEAT*L3, Z).weight
    p["fc0_b"] = r(7, (Z,))
    p["fcmu_w"] = r(8, (Z, Z))
    p["fcmu_b"] = r(9, (Z,))
    p["fcvar_w"] = r(10, (Z, Z))
    p["fcvar_b"] = r(11, (Z,))
    return p


def pack_params(p):
    """Pack the PyTorch-layout params into 3 blobs (done once, outside the jitted forward)."""
    convp = jnp.zeros((3, _CONVP_ROWS, FEAT), jnp.float32)
    for i, k in enumerate(KS):
        convp = convp.at[i, 0:k, :].set(jnp.transpose(p[f"conv{i}_w"][:, 0, :]))  # [j, c] = w[c,0,j]
        convp = convp.at[i, _ROW_BIAS, :].set(p[f"conv{i}_b"])
        convp = convp.at[i, _ROW_GAMMA, :].set(p[f"bn{i}_g"])
        convp = convp.at[i, _ROW_BETA, :].set(p[f"bn{i}_b"])

    # PyTorch flattens the (B, FEAT, L3) activation channel-major (flat = c*L3 + t); the kernel
    # flattens its (B, L3, FEAT) activation time-major (flat = t*FEAT + c).  Re-index the weight so
    # both agree:  w0b[t*FEAT + c, z] = fc0_w[z, c*L3 + t].
    w0 = jnp.transpose(p["fc0_w"].reshape(Z, FEAT, L3), (2, 1, 0)).reshape(KFLAT, Z)
    w0b = jnp.concatenate([w0, p["fc0_b"][None, :]], axis=0)                        # (KFLAT+1, Z)

    wmv = jnp.concatenate(
        [jnp.concatenate([p["fcmu_w"].T, p["fcvar_w"].T], axis=1),
         jnp.concatenate([p["fcmu_b"], p["fcvar_b"]])[None, :]], axis=0)            # (Z+1, 2Z)
    return convp, w0b, wmv


def encoder_reference(x, p):
    """Pure-JAX re-implementation of the PyTorch Encoder.forward (training-mode BatchNorm)."""
    a = jnp.transpose(x, (0, 2, 1)).astype(jnp.float32)          # (B, FEAT, SEQ)
    for i, k in enumerate(KS):
        w, b = p[f"conv{i}_w"], p[f"conv{i}_b"]
        lout = a.shape[-1] - k + 1
        acc = sum(a[:, :, j:j + lout] * w[:, 0, j][None, :, None] for j in range(k))
        acc = acc + b[None, :, None]
        mean = jnp.mean(acc, axis=(0, 2), keepdims=True)
        var = jnp.mean((acc - mean) ** 2, axis=(0, 2), keepdims=True)
        a = (acc - mean) / jnp.sqrt(var + BN_EPS) * p[f"bn{i}_g"][None, :, None] \
            + p[f"bn{i}_b"][None, :, None]
        a = jnp.maximum(a, 0.0)
    h = a.reshape(a.shape[0], -1) @ p["fc0_w"].T + p["fc0_b"]
    mu = h @ p["fcmu_w"].T + p["fcmu_b"]
    var_out = h @ p["fcvar_w"].T + p["fcvar_b"]
    return mu, var_out


if __name__ == "__main__":
    key = jax.random.PRNGKey(0)
    k_x, k_p = jax.random.split(key)

    x = jax.random.normal(k_x, (B, SEQ, FEAT), dtype=jnp.float32)   # native (B, SEQ, FEAT) input
    params = init_params(k_p)
    convp, w0b, wmv = pack_params(params)                           # packed once, outside jit

    fwd = jax.jit(encoder_forward)
    mu, var = fwd(x, convp, w0b, wmv)
    jax.block_until_ready((mu, var))

    assert mu.shape == (B, Z) and var.shape == (B, Z)
    assert bool(jnp.all(jnp.isfinite(mu))) and bool(jnp.all(jnp.isfinite(var)))

    # Cross-check against the pure-JAX reference of the PyTorch forward.  Tolerance is loose only
    # to absorb MXU default-precision (bf16-pass) f32 matmul differences; layout/packing bugs would
    # show up as O(1) mismatches.
    mu_ref, var_ref = encoder_reference(x, params)
    assert bool(jnp.allclose(mu, mu_ref, atol=2e-2, rtol=2e-2)), \
        float(jnp.max(jnp.abs(mu - mu_ref)))
    assert bool(jnp.allclose(var, var_ref, atol=2e-2, rtol=2e-2)), \
        float(jnp.max(jnp.abs(var - var_ref)))

    print("KERNEL_OK")
</pallas_src>

<mosaic_0001>
module attributes {stable_mosaic.version = 11 : i64} {
  func.func @encoder_kernel(%arg0: memref<2x15x12xf32, #tpu.memory_space<vmem>>, %arg1: memref<3x7x12xf32, #tpu.memory_space<vmem>>, %arg2: memref<109x32xf32, #tpu.memory_space<vmem>>, %arg3: memref<33x64xf32, #tpu.memory_space<vmem>>, %arg4: memref<2x32xf32, #tpu.memory_space<vmem>>, %arg5: memref<2x32xf32, #tpu.memory_space<vmem>>, %arg6: memref<2x108xf32, #tpu.memory_space<vmem>>) attributes {dimension_semantics = [], scalar_prefetch = 0 : i64, scratch_operands = 1 : i64, tpu.core_type = #tpu.core_type<tc>} {
    %c0 = arith.constant 0 : index
    %c0_0 = arith.constant 0 : index
    %c0_1 = arith.constant 0 : index
    %0 = vector.load %arg0[%c0, %c0_0, %c0_1] : memref<2x15x12xf32, #tpu.memory_space<vmem>>, vector<2x15x12xf32>
    %c0_2 = arith.constant 0 : index
    %c0_3 = arith.constant 0 : index
    %c0_4 = arith.constant 0 : index
    %1 = vector.load %arg1[%c0_2, %c0_3, %c0_4] : memref<3x7x12xf32, #tpu.memory_space<vmem>>, vector<3x7x12xf32>
    %2 = vector.extract_strided_slice %0 {offsets = [0, 0, 0], sizes = [2, 14, 12], strides = [1, 1, 1]} : vector<2x15x12xf32> to vector<2x14x12xf32>
    %3 = vector.extract_strided_slice %1 {offsets = [0, 0, 0], sizes = [1, 1, 12], strides = [1, 1, 1]} : vector<3x7x12xf32> to vector<1x1x12xf32>
    %4 = vector.broadcast %3 : vector<1x1x12xf32> to vector<2x14x12xf32>
    %5 = arith.mulf %2, %4 : vector<2x14x12xf32>
    %6 = vector.extract_strided_slice %0 {offsets = [0, 1, 0], sizes = [2, 14, 12], strides = [1, 1, 1]} : vector<2x15x12xf32> to vector<2x14x12xf32>
    %7 = vector.extract_strided_slice %1 {offsets = [0, 1, 0], sizes = [1, 1, 12], strides = [1, 1, 1]} : vector<3x7x12xf32> to vector<1x1x12xf32>
    %8 = vector.broadcast %7 : vector<1x1x12xf32> to vector<2x14x12xf32>
    %9 = arith.mulf %6, %8 : vector<2x14x12xf32>
    %10 = arith.addf %5, %9 : vector<2x14x12xf32>
    %11 = vector.extract_strided_slice %1 {offsets = [0, 4, 0], sizes = [1, 1, 12], strides = [1, 1, 1]} : vector<3x7x12xf32> to vector<1x1x12xf32>
    %12 = vector.broadcast %11 : vector<1x1x12xf32> to vector<2x14x12xf32>
    %13 = arith.addf %10, %12 : vector<2x14x12xf32>
    %cst = arith.constant dense<0.000000e+00> : vector<12xf32>
    %14 = vector.multi_reduction <add>, %13, %cst [0, 1] : vector<2x14x12xf32> to vector<12xf32>
    %15 = vector.shape_cast %14 : vector<12xf32> to vector<1x1x12xf32>
    %cst_5 = arith.constant 0.0357142873 : f32
    %16 = vector.broadcast %cst_5 : f32 to vector<1x1x12xf32>
    %17 = arith.mulf %15, %16 : vector<1x1x12xf32>
    %18 = arith.mulf %13, %13 : vector<2x14x12xf32>
    %cst_6 = arith.constant dense<0.000000e+00> : vector<12xf32>
    %19 = vector.multi_reduction <add>, %18, %cst_6 [0, 1] : vector<2x14x12xf32> to vector<12xf32>
    %20 = vector.shape_cast %19 : vector<12xf32> to vector<1x1x12xf32>
    %cst_7 = arith.constant 0.0357142873 : f32
    %21 = vector.broadcast %cst_7 : f32 to vector<1x1x12xf32>
    %22 = arith.mulf %20, %21 : vector<1x1x12xf32>
    %23 = arith.mulf %17, %17 : vector<1x1x12xf32>
    %24 = arith.subf %22, %23 : vector<1x1x12xf32>
    %25 = vector.extract_strided_slice %1 {offsets = [0, 5, 0], sizes = [1, 1, 12], strides = [1, 1, 1]} : vector<3x7x12xf32> to vector<1x1x12xf32>
    %cst_8 = arith.constant 9.99999974E-6 : f32
    %26 = vector.broadcast %cst_8 : f32 to vector<1x1x12xf32>
    %27 = arith.addf %24, %26 : vector<1x1x12xf32>
    %28 = math.rsqrt %27 : vector<1x1x12xf32>
    %29 = arith.mulf %25, %28 : vector<1x1x12xf32>
    %30 = vector.broadcast %17 : vector<1x1x12xf32> to vector<2x14x12xf32>
    %31 = arith.subf %13, %30 : vector<2x14x12xf32>
    %32 = vector.broadcast %29 : vector<1x1x12xf32> to vector<2x14x12xf32>
    %33 = arith.mulf %31, %32 : vector<2x14x12xf32>
    %34 = vector.extract_strided_slice %1 {offsets = [0, 6, 0], sizes = [1, 1, 12], strides = [1, 1, 1]} : vector<3x7x12xf32> to vector<1x1x12xf32>
    %35 = vector.broadcast %34 : vector<1x1x12xf32> to vector<2x14x12xf32>
    %36 = arith.addf %33, %35 : vector<2x14x12xf32>
    %cst_9 = arith.constant 0.000000e+00 : f32
    %37 = vector.broadcast %cst_9 : f32 to vector<2x14x12xf32>
    %38 = arith.maximumf %36, %37 : vector<2x14x12xf32>
    %39 = vector.extract_strided_slice %38 {offsets = [0, 0, 0], sizes = [2, 12, 12], strides = [1, 1, 1]} : vector<2x14x12xf32> to vector<2x12x12xf32>
    %40 = vector.extract_strided_slice %1 {offsets = [1, 0, 0], sizes = [1, 1, 12], strides = [1, 1, 1]} : vector<3x7x12xf32> to vector<1x1x12xf32>
    %41 = vector.broadcast %40 : vector<1x1x12xf32> to vector<2x12x12xf32>
    %42 = arith.mulf %39, %41 : vector<2x12x12xf32>
    %43 = vector.extract_strided_slice %38 {offsets = [0, 1, 0], sizes = [2, 12, 12], strides = [1, 1, 1]} : vector<2x14x12xf32> to vector<2x12x12xf32>
    %44 = vector.extract_strided_slice %1 {offsets = [1, 1, 0], sizes = [1, 1, 12], strides = [1, 1, 1]} : vector<3x7x12xf32> to vector<1x1x12xf32>
    %45 = vector.broadcast %44 : vector<1x1x12xf32> to vector<2x12x12xf32>
    %46 = arith.mulf %43, %45 : vector<2x12x12xf32>
    %47 = arith.addf %42, %46 : vector<2x12x12xf32>
    %48 = vector.extract_strided_slice %38 {offsets = [0, 2, 0], sizes = [2, 12, 12], strides = [1, 1, 1]} : vector<2x14x12xf32> to vector<2x12x12xf32>
    %49 = vector.extract_strided_slice %1 {offsets = [1, 2, 0], sizes = [1, 1, 12], strides = [1, 1, 1]} : vector<3x7x12xf32> to vector<1x1x12xf32>
    %50 = vector.broadcast %49 : vector<1x1x12xf32> to vector<2x12x12xf32>
    %51 = arith.mulf %48, %50 : vector<2x12x12xf32>
    %52 = arith.addf %47, %51 : vector<2x12x12xf32>
    %53 = vector.extract_strided_slice %1 {offsets = [1, 4, 0], sizes = [1, 1, 12], strides = [1, 1, 1]} : vector<3x7x12xf32> to vector<1x1x12xf32>
    %54 = vector.broadcast %53 : vector<1x1x12xf32> to vector<2x12x12xf32>
    %55 = arith.addf %52, %54 : vector<2x12x12xf32>
    %cst_10 = arith.constant dense<0.000000e+00> : vector<12xf32>
    %56 = vector.multi_reduction <add>, %55, %cst_10 [0, 1] : vector<2x12x12xf32> to vector<12xf32>
    %57 = vector.shape_cast %56 : vector<12xf32> to vector<1x1x12xf32>
    %cst_11 = arith.constant 0.0416666679 : f32
    %58 = vector.broadcast %cst_11 : f32 to vector<1x1x12xf32>
    %59 = arith.mulf %57, %58 : vector<1x1x12xf32>
    %60 = arith.mulf %55, %55 : vector<2x12x12xf32>
    %cst_12 = arith.constant dense<0.000000e+00> : vector<12xf32>
    %61 = vector.multi_reduction <add>, %60, %cst_12 [0, 1] : vector<2x12x12xf32> to vector<12xf32>
    %62 = vector.shape_cast %61 : vector<12xf32> to vector<1x1x12xf32>
    %cst_13 = arith.constant 0.0416666679 : f32
    %63 = vector.broadcast %cst_13 : f32 to vector<1x1x12xf32>
    %64 = arith.mulf %62, %63 : vector<1x1x12xf32>
    %65 = arith.mulf %59, %59 : vector<1x1x12xf32>
    %66 = arith.subf %64, %65 : vector<1x1x12xf32>
    %67 = vector.extract_strided_slice %1 {offsets = [1, 5, 0], sizes = [1, 1, 12], strides = [1, 1, 1]} : vector<3x7x12xf32> to vector<1x1x12xf32>
    %cst_14 = arith.constant 9.99999974E-6 : f32
    %68 = vector.broadcast %cst_14 : f32 to vector<1x1x12xf32>
    %69 = arith.addf %66, %68 : vector<1x1x12xf32>
    %70 = math.rsqrt %69 : vector<1x1x12xf32>
    %71 = arith.mulf %67, %70 : vector<1x1x12xf32>
    %72 = vector.broadcast %59 : vector<1x1x12xf32> to vector<2x12x12xf32>
    %73 = arith.subf %55, %72 : vector<2x12x12xf32>
    %74 = vector.broadcast %71 : vector<1x1x12xf32> to vector<2x12x12xf32>
    %75 = arith.mulf %73, %74 : vector<2x12x12xf32>
    %76 = vector.extract_strided_slice %1 {offsets = [1, 6, 0], sizes = [1, 1, 12], strides = [1, 1, 1]} : vector<3x7x12xf32> to vector<1x1x12xf32>
    %77 = vector.broadcast %76 : vector<1x1x12xf32> to vector<2x12x12xf32>
    %78 = arith.addf %75, %77 : vector<2x12x12xf32>
    %cst_15 = arith.constant 0.000000e+00 : f32
    %79 = vector.broadcast %cst_15 : f32 to vector<2x12x12xf32>
    %80 = arith.maximumf %78, %79 : vector<2x12x12xf32>
    %81 = vector.extract_strided_slice %80 {offsets = [0, 0, 0], sizes = [2, 9, 12], strides = [1, 1, 1]} : vector<2x12x12xf32> to vector<2x9x12xf32>
    %82 = vector.extract_strided_slice %1 {offsets = [2, 0, 0], sizes = [1, 1, 12], strides = [1, 1, 1]} : vector<3x7x12xf32> to vector<1x1x12xf32>
    %83 = vector.broadcast %82 : vector<1x1x12xf32> to vector<2x9x12xf32>
    %84 = arith.mulf %81, %83 : vector<2x9x12xf32>
    %85 = vector.extract_strided_slice %80 {offsets = [0, 1, 0], sizes = [2, 9, 12], strides = [1, 1, 1]} : vector<2x12x12xf32> to vector<2x9x12xf32>
    %86 = vector.extract_strided_slice %1 {offsets = [2, 1, 0], sizes = [1, 1, 12], strides = [1, 1, 1]} : vector<3x7x12xf32> to vector<1x1x12xf32>
    %87 = vector.broadcast %86 : vector<1x1x12xf32> to vector<2x9x12xf32>
    %88 = arith.mulf %85, %87 : vector<2x9x12xf32>
    %89 = arith.addf %84, %88 : vector<2x9x12xf32>
    %90 = vector.extract_strided_slice %80 {offsets = [0, 2, 0], sizes = [2, 9, 12], strides = [1, 1, 1]} : vector<2x12x12xf32> to vector<2x9x12xf32>
    %91 = vector.extract_strided_slice %1 {offsets = [2, 2, 0], sizes = [1, 1, 12], strides = [1, 1, 1]} : vector<3x7x12xf32> to vector<1x1x12xf32>
    %92 = vector.broadcast %91 : vector<1x1x12xf32> to vector<2x9x12xf32>
    %93 = arith.mulf %90, %92 : vector<2x9x12xf32>
    %94 = arith.addf %89, %93 : vector<2x9x12xf32>
    %95 = vector.extract_strided_slice %80 {offsets = [0, 3, 0], sizes = [2, 9, 12], strides = [1, 1, 1]} : vector<2x12x12xf32> to vector<2x9x12xf32>
    %96 = vector.extract_strided_slice %1 {offsets = [2, 3, 0], sizes = [1, 1, 12], strides = [1, 1, 1]} : vector<3x7x12xf32> to vector<1x1x12xf32>
    %97 = vector.broadcast %96 : vector<1x1x12xf32> to vector<2x9x12xf32>
    %98 = arith.mulf %95, %97 : vector<2x9x12xf32>
    %99 = arith.addf %94, %98 : vector<2x9x12xf32>
    %100 = vector.extract_strided_slice %1 {offsets = [2, 4, 0], sizes = [1, 1, 12], strides = [1, 1, 1]} : vector<3x7x12xf32> to vector<1x1x12xf32>
    %101 = vector.broadcast %100 : vector<1x1x12xf32> to vector<2x9x12xf32>
    %102 = arith.addf %99, %101 : vector<2x9x12xf32>
    %cst_16 = arith.constant dense<0.000000e+00> : vector<12xf32>
    %103 = vector.multi_reduction <add>, %102, %cst_16 [0, 1] : vector<2x9x12xf32> to vector<12xf32>
    %104 = vector.shape_cast %103 : vector<12xf32> to vector<1x1x12xf32>
    %cst_17 = arith.constant 0.055555556 : f32
    %105 = vector.broadcast %cst_17 : f32 to vector<1x1x12xf32>
    %106 = arith.mulf %104, %105 : vector<1x1x12xf32>
    %107 = arith.mulf %102, %102 : vector<2x9x12xf32>
    %cst_18 = arith.constant dense<0.000000e+00> : vector<12xf32>
    %108 = vector.multi_reduction <add>, %107, %cst_18 [0, 1] : vector<2x9x12xf32> to vector<12xf32>
    %109 = vector.shape_cast %108 : vector<12xf32> to vector<1x1x12xf32>
    %cst_19 = arith.constant 0.055555556 : f32
    %110 = vector.broadcast %cst_19 : f32 to vector<1x1x12xf32>
    %111 = arith.mulf %109, %110 : vector<1x1x12xf32>
    %112 = arith.mulf %106, %106 : vector<1x1x12xf32>
    %113 = arith.subf %111, %112 : vector<1x1x12xf32>
    %114 = vector.extract_strided_slice %1 {offsets = [2, 5, 0], sizes = [1, 1, 12], strides = [1, 1, 1]} : vector<3x7x12xf32> to vector<1x1x12xf32>
    %cst_20 = arith.constant 9.99999974E-6 : f32
    %115 = vector.broadcast %cst_20 : f32 to vector<1x1x12xf32>
    %116 = arith.addf %113, %115 : vector<1x1x12xf32>
    %117 = math.rsqrt %116 : vector<1x1x12xf32>
    %118 = arith.mulf %114, %117 : vector<1x1x12xf32>
    %119 = vector.broadcast %106 : vector<1x1x12xf32> to vector<2x9x12xf32>
    %120 = arith.subf %102, %119 : vector<2x9x12xf32>
    %121 = vector.broadcast %118 : vector<1x1x12xf32> to vector<2x9x12xf32>
    %122 = arith.mulf %120, %121 : vector<2x9x12xf32>
    %123 = vector.extract_strided_slice %1 {offsets = [2, 6, 0], sizes = [1, 1, 12], strides = [1, 1, 1]} : vector<3x7x12xf32> to vector<1x1x12xf32>
    %124 = vector.broadcast %123 : vector<1x1x12xf32> to vector<2x9x12xf32>
    %125 = arith.addf %122, %124 : vector<2x9x12xf32>
    %cst_21 = arith.constant 0.000000e+00 : f32
    %126 = vector.broadcast %cst_21 : f32 to vector<2x9x12xf32>
    %127 = arith.maximumf %125, %126 : vector<2x9x12xf32>
    %128 = vector.extract_strided_slice %127 {offsets = [0, 0, 0], sizes = [2, 1, 12], strides = [1, 1, 1]} : vector<2x9x12xf32> to vector<2x1x12xf32>
    %129 = vector.shape_cast %128 : vector<2x1x12xf32> to vector<2x12xf32>
    %c0_22 = arith.constant 0 : index
    %c0_23 = arith.constant 0 : index
    %130 = vector.load %arg6[%c0_22, %c0_23] : memref<2x108xf32, #tpu.memory_space<vmem>>, vector<2x12xf32>
    tpu.vector_store %arg6[%c0_22, %c0_23], %129 {strides = array<i32>} : memref<2x108xf32, #tpu.memory_space<vmem>>, vector<2x12xf32>,
    %131 = vector.extract_strided_slice %127 {offsets = [0, 1, 0], sizes = [2, 1, 12], strides = [1, 1, 1]} : vector<2x9x12xf32> to vector<2x1x12xf32>
    %132 = vector.shape_cast %131 : vector<2x1x12xf32> to vector<2x12xf32>
    %c0_24 = arith.constant 0 : index
    %c12 = arith.constant 12 : index
    %133 = vector.load %arg6[%c0_24, %c12] : memref<2x108xf32, #tpu.memory_space<vmem>>, vector<2x12xf32>
    tpu.vector_store %arg6[%c0_24, %c12], %132 {strides = array<i32>} : memref<2x108xf32, #tpu.memory_space<vmem>>, vector<2x12xf32>,
    %134 = vector.extract_strided_slice %127 {offsets = [0, 2, 0], sizes = [2, 1, 12], strides = [1, 1, 1]} : vector<2x9x12xf32> to vector<2x1x12xf32>
    %135 = vector.shape_cast %134 : vector<2x1x12xf32> to vector<2x12xf32>
    %c0_25 = arith.constant 0 : index
    %c24 = arith.constant 24 : index
    %136 = vector.load %arg6[%c0_25, %c24] : memref<2x108xf32, #tpu.memory_space<vmem>>, vector<2x12xf32>
    tpu.vector_store %arg6[%c0_25, %c24], %135 {strides = array<i32>} : memref<2x108xf32, #tpu.memory_space<vmem>>, vector<2x12xf32>,
    %137 = vector.extract_strided_slice %127 {offsets = [0, 3, 0], sizes = [2, 1, 12], strides = [1, 1, 1]} : vector<2x9x12xf32> to vector<2x1x12xf32>
    %138 = vector.shape_cast %137 : vector<2x1x12xf32> to vector<2x12xf32>
    %c0_26 = arith.constant 0 : index
    %c36 = arith.constant 36 : index
    %139 = vector.load %arg6[%c0_26, %c36] : memref<2x108xf32, #tpu.memory_space<vmem>>, vector<2x12xf32>
    tpu.vector_store %arg6[%c0_26, %c36], %138 {strides = array<i32>} : memref<2x108xf32, #tpu.memory_space<vmem>>, vector<2x12xf32>,
    %140 = vector.extract_strided_slice %127 {offsets = [0, 4, 0], sizes = [2, 1, 12], strides = [1, 1, 1]} : vector<2x9x12xf32> to vector<2x1x12xf32>
    %141 = vector.shape_cast %140 : vector<2x1x12xf32> to vector<2x12xf32>
    %c0_27 = arith.constant 0 : index
    %c48 = arith.constant 48 : index
    %142 = vector.load %arg6[%c0_27, %c48] : memref<2x108xf32, #tpu.memory_space<vmem>>, vector<2x12xf32>
    tpu.vector_store %arg6[%c0_27, %c48], %141 {strides = array<i32>} : memref<2x108xf32, #tpu.memory_space<vmem>>, vector<2x12xf32>,
    %143 = vector.extract_strided_slice %127 {offsets = [0, 5, 0], sizes = [2, 1, 12], strides = [1, 1, 1]} : vector<2x9x12xf32> to vector<2x1x12xf32>
    %144 = vector.shape_cast %143 : vector<2x1x12xf32> to vector<2x12xf32>
    %c0_28 = arith.constant 0 : index
    %c60 = arith.constant 60 : index
    %145 = vector.load %arg6[%c0_28, %c60] : memref<2x108xf32, #tpu.memory_space<vmem>>, vector<2x12xf32>
    tpu.vector_store %arg6[%c0_28, %c60], %144 {strides = array<i32>} : memref<2x108xf32, #tpu.memory_space<vmem>>, vector<2x12xf32>,
    %146 = vector.extract_strided_slice %127 {offsets = [0, 6, 0], sizes = [2, 1, 12], strides = [1, 1, 1]} : vector<2x9x12xf32> to vector<2x1x12xf32>
    %147 = vector.shape_cast %146 : vector<2x1x12xf32> to vector<2x12xf32>
    %c0_29 = arith.constant 0 : index
    %c72 = arith.constant 72 : index
    %148 = vector.load %arg6[%c0_29, %c72] : memref<2x108xf32, #tpu.memory_space<vmem>>, vector<2x12xf32>
    tpu.vector_store %arg6[%c0_29, %c72], %147 {strides = array<i32>} : memref<2x108xf32, #tpu.memory_space<vmem>>, vector<2x12xf32>,
    %149 = vector.extract_strided_slice %127 {offsets = [0, 7, 0], sizes = [2, 1, 12], strides = [1, 1, 1]} : vector<2x9x12xf32> to vector<2x1x12xf32>
    %150 = vector.shape_cast %149 : vector<2x1x12xf32> to vector<2x12xf32>
    %c0_30 = arith.constant 0 : index
    %c84 = arith.constant 84 : index
    %151 = vector.load %arg6[%c0_30, %c84] : memref<2x108xf32, #tpu.memory_space<vmem>>, vector<2x12xf32>
    tpu.vector_store %arg6[%c0_30, %c84], %150 {strides = array<i32>} : memref<2x108xf32, #tpu.memory_space<vmem>>, vector<2x12xf32>,
    %152 = vector.extract_strided_slice %127 {offsets = [0, 8, 0], sizes = [2, 1, 12], strides = [1, 1, 1]} : vector<2x9x12xf32> to vector<2x1x12xf32>
    %153 = vector.shape_cast %152 : vector<2x1x12xf32> to vector<2x12xf32>
    %c0_31 = arith.constant 0 : index
    %c96 = arith.constant 96 : index
    %154 = vector.load %arg6[%c0_31, %c96] : memref<2x108xf32, #tpu.memory_space<vmem>>, vector<2x12xf32>
    tpu.vector_store %arg6[%c0_31, %c96], %153 {strides = array<i32>} : memref<2x108xf32, #tpu.memory_space<vmem>>, vector<2x12xf32>,
    %c0_32 = arith.constant 0 : index
    %c0_33 = arith.constant 0 : index
    %155 = vector.load %arg6[%c0_32, %c0_33] : memref<2x108xf32, #tpu.memory_space<vmem>>, vector<2x108xf32>
    %c0_34 = arith.constant 0 : index
    %c0_35 = arith.constant 0 : index
    %156 = vector.load %arg2[%c0_34, %c0_35] : memref<109x32xf32, #tpu.memory_space<vmem>>, vector<109x32xf32>
    %157 = vector.extract_strided_slice %156 {offsets = [0, 0], sizes = [108, 32], strides = [1, 1]} : vector<109x32xf32> to vector<108x32xf32>
    %cst_36 = arith.constant dense<0.000000e+00> : vector<2x32xf32>
    %158 = tpu.matmul %155, %157, %cst_36 {dimension_numbers = #tpu.dot_dimension_numbers<[1], [0], [0], [1], [0, 0, 1, 1], [], []>} : vector<2x108xf32>, vector<108x32xf32>, vector<2x32xf32> -> vector<2x32xf32>
    %159 = vector.extract_strided_slice %156 {offsets = [108, 0], sizes = [1, 32], strides = [1, 1]} : vector<109x32xf32> to vector<1x32xf32>
    %160 = vector.broadcast %159 : vector<1x32xf32> to vector<2x32xf32>
    %161 = arith.addf %158, %160 : vector<2x32xf32>
    %c0_37 = arith.constant 0 : index
    %c0_38 = arith.constant 0 : index
    %162 = vector.load %arg3[%c0_37, %c0_38] : memref<33x64xf32, #tpu.memory_space<vmem>>, vector<33x64xf32>
    %163 = vector.extract_strided_slice %162 {offsets = [0, 0], sizes = [32, 64], strides = [1, 1]} : vector<33x64xf32> to vector<32x64xf32>
    %cst_39 = arith.constant dense<0.000000e+00> : vector<2x64xf32>
    %164 = tpu.matmul %161, %163, %cst_39 {dimension_numbers = #tpu.dot_dimension_numbers<[1], [0], [0], [1], [0, 0, 1, 1], [], []>} : vector<2x32xf32>, vector<32x64xf32>, vector<2x64xf32> -> vector<2x64xf32>
    %165 = vector.extract_strided_slice %162 {offsets = [32, 0], sizes = [1, 64], strides = [1, 1]} : vector<33x64xf32> to vector<1x64xf32>
    %166 = vector.broadcast %165 : vector<1x64xf32> to vector<2x64xf32>
    %167 = arith.addf %164, %166 : vector<2x64xf32>
    %168 = vector.extract_strided_slice %167 {offsets = [0, 0], sizes = [2, 32], strides = [1, 1]} : vector<2x64xf32> to vector<2x32xf32>
    %c0_40 = arith.constant 0 : index
    %c0_41 = arith.constant 0 : index
    %169 = vector.load %arg4[%c0_40, %c0_41] : memref<2x32xf32, #tpu.memory_space<vmem>>, vector<2x32xf32>
    tpu.vector_store %arg4[%c0_40, %c0_41], %168 {strides = array<i32>} : memref<2x32xf32, #tpu.memory_space<vmem>>, vector<2x32xf32>,
    %170 = vector.extract_strided_slice %167 {offsets = [0, 32], sizes = [2, 32], strides = [1, 1]} : vector<2x64xf32> to vector<2x32xf32>
    %c0_42 = arith.constant 0 : index
    %c0_43 = arith.constant 0 : index
    %171 = vector.load %arg5[%c0_42, %c0_43] : memref<2x32xf32, #tpu.memory_space<vmem>>, vector<2x32xf32>
    tpu.vector_store %arg5[%c0_42, %c0_43], %170 {strides = array<i32>} : memref<2x32xf32, #tpu.memory_space<vmem>>, vector<2x32xf32>,
    return
  }
}

</mosaic_0001>

<bundles_post_ra>
// kernel: encoder_forward.1
= control target key start
LH: loop header
LB: loop body
LE: loop exit
PB: predicated region body
PF: predicated region fallthrough
CT: control target
= control target key end

     0   :  { %11 = vsyncpa [#allocation4], 0  ;;  %v28_v0 = vlaneseq  ;;  %s1097_s0 = inlined_call_operand.vmem [shape: f32[2,15,12], index: 0, kind: input, shape index: {}]   ;;  %s1098_s1 = inlined_call_operand.vmem [shape: f32[3,7,12], index: 1, kind: input, shape index: {}]   ;;  %s1099_s2 = inlined_call_operand.vmem [shape: f32[109,32], index: 2, kind: input, shape index: {}]   ;;  %s1100_s3 = inlined_call_operand.vmem [shape: f32[33,64], index: 3, kind: input, shape index: {}]   ;;  %s1101_s4 = inlined_call_operand.hbm [shape: f32[2,32], index: 4, kind: output, shape index: {0}]   ;;  %s1102_s5 = inlined_call_operand.hbm [shape: f32[2,32], index: 5, kind: output, shape index: {1}]  }
   0x1   :  { %v881_v2 = vld [vmem:[%s1098_s1] sm:$0x7f] }
   0x2   :  { %v876_v1 = vshrl.u32 %v28_v0, 7 }
   0x3   :  { %12 = vsyncpa [#allocation6], 0  ;;  %v21_v5 = vld [vmem:[%s1097_s0] sm:$0xff]  ;;  %v22_v6 = vld [vmem:[%s1097_s0 + $0x8] sm:$0x7f]  ;;  %vm48_vm0 = vcmask 1046528  }
   0x4   :  { %v884_v3 = vsub.s32 0, %v876_v1  ;;  %v887_v4 = vsub.s32 1, %v876_v1  ;;  %v23_v7 = vld [vmem:[%s1097_s0 + $0x10] sm:$0xff]  ;;  %v24_v8 = vld [vmem:[%s1097_s0 + $0x18] sm:$0x7f]  ;;  %v906_v11 = vsub.s32 4, %v876_v1 }
   0x5   :  { %vm73_vm1 = vcmask 95232   ;;  %vm71_vm2 = vcmask 97280   ;;  %vm180_vm3 = vcmask 1045504   ;;  %vm204_vm4 = vcmask 93184   ;;  %s835_s23 = smov 84   ;;  %s836_s26 = smov 36  }
   0x6   :  { %v31_v9 = vrot.slane %v881_v2, %v884_v3  ;;  %v39_v10 = vrot.slane %v881_v2, %v887_v4  ;;  %v66_v20 = vrot.slane %v881_v2, %v906_v11  ;;  %vm514_vm5 = vcmask 1043456   ;;  %s837_s28 = smov 12   ;;  %s839_s8 = smov 48  }
   0x7   :  { %vm337_vm6 = vcmask 1044480   ;;  %vm361_vm7 = vcmask 90112   ;;  %vm444_vm8 = vcmask 1044484   ;;  %vm430_vm9 = vcmask 1042434   ;;  %s840_s9 = smov 24   ;;  %s841_s11 = smov 72  }
   0x8   :  { %v33_v12 = vmul.f32 %v31_v9, %v22_v6  ;;  %v35_v13 = vmul.f32 %v31_v9, %v24_v8  ;;  %v40_v14 = vmul.f32 %v39_v10, %v21_v5  ;;  %v41_v15 = vmul.f32 %v39_v10, %v22_v6  ;;  %s842_s16 = smov 60  }
   0x9   :  { %v42_v16 = vmul.f32 %v39_v10, %v23_v7  ;;  %v43_v17 = vmul.f32 %v39_v10, %v24_v8  ;;  %v32_v18 = vmul.f32 %v31_v9, %v21_v5  ;;  %v34_v19 = vmul.f32 %v31_v9, %v23_v7 }
   0xa   :  { %v49_v21 = vrot.slane %v40_v14, 1  ;;  %v50_v22 = vrot.slane %v41_v15, 1  ;;  %v921_v10 = vsub.s32 5, %v876_v1  ;;  %vm451_vm10 = vcmask 1045509  }
   0xb   :  { %v52_v23 = vrot.slane %v42_v16, 1  ;;  %v53_v24 = vrot.slane %v43_v17, 1  ;;  %vm437_vm11 = vcmask 1043459   ;;  %vm465_vm12 = vcmask 1047559  }
   0xc   :  { %v51_v25 = vsel %vm48_vm0, %v49_v21, %v50_v22  ;;  %v60_v27 = vadd.f32 %v50_v22, %v33_v12  ;;  %v924_v12 = vsub.s32 6, %v876_v1  ;;  %v170_v21 = vsub.s32 2, %v876_v1  ;;  %v934_v22 = vld [vmem:[%s1098_s1 + $0x8] sm:$0x7f] }
   0xd   :  { %v54_v26 = vsel %vm48_vm0, %v52_v23, %v53_v24  ;;  %v62_v28 = vadd.f32 %v53_v24, %v35_v13  ;;  %v59_v29 = vadd.f32 %v51_v25, %v32_v18  ;;  %vm458_vm13 = vcmask 1046534  }
   0xe   :  { %v61_v30 = vadd.f32 %v54_v26, %v34_v19  ;;  %v68_v31 = vadd.f32 %v66_v20, %v60_v27  ;;  %v137_v27 = vrot.slane %v934_v22, %v884_v3  ;;  %vm425_vm14 = vcmask 1041409  }
   0xf   :  { %v70_v32 = vadd.f32 %v66_v20, %v62_v28  ;;  %v67_v33 = vadd.f32 %v66_v20, %v59_v29  ;;  %vm428_vm15 = vcmask 91136  }
  0x10   :  { %v69_v34 = vadd.f32 %v66_v20, %v61_v30  ;;  %v74_v35 = vsel %vm73_vm1, %v68_v31, 0.0  ;;  %v88_v36 = vmul.f32 %v68_v31, %v68_v31  ;;  %v125_v20 = vrot.slane %v881_v2, %v924_v12 }
  0x11   :  { %v90_v37 = vmul.f32 %v70_v32, %v70_v32  ;;  %v72_v38 = vsel %vm71_vm2, %v67_v33, 0.0  ;;  %v87_v40 = vmul.f32 %v67_v33, %v67_v33  ;;  %v78_v44 = vsel %vm73_vm1, %v70_v32, 0.0 }
  0x12   :  { %v76_v39 = vsel %vm71_vm2, %v69_v34, 0.0  ;;  %v89_v41 = vmul.f32 %v69_v34, %v69_v34  ;;  %v75_v42 = vadd.f32 %v74_v35, %v72_v38  ;;  %v92_v43 = vsel %vm73_vm1, %v88_v36, 0.0 }
  0x13   :  { %v91_v45 = vsel %vm71_vm2, %v87_v40, 0.0  ;;  %v96_v49 = vsel %vm73_vm1, %v90_v37, 0.0  ;;  %v198_v37 = vrot.slane %v934_v22, %v906_v11  ;;  %vm435_vm1 = vcmask 190561  }
  0x14   :  { %v94_v46 = vsel %vm71_vm2, %v89_v41, 0.0  ;;  %v77_v47 = vadd.f32 %v76_v39, %v75_v42  ;;  %v93_v48 = vadd.f32 %v92_v43, %v91_v45 }
  0x16   :  { %v79_v50 = vadd.f32 %v78_v44, %v77_v47  ;;  %v95_v51 = vadd.f32 %v94_v46, %v93_v48 }
  0x18   :  { %v80_v52 = vrot.slane %v79_v50, 4  ;;  %v97_v53 = vadd.f32 %v96_v49, %v95_v51 }
  0x1a   :  { %v81_v54 = vadd.f32 %v80_v52, %v79_v50  ;;  %v98_v55 = vrot.slane %v97_v53, 4 }
  0x1c   :  { %v82_v56 = vrot.slane %v81_v54, 2  ;;  %v99_v57 = vadd.f32 %v98_v55, %v97_v53 }
  0x1e   :  { %v83_v58 = vadd.f32 %v82_v56, %v81_v54  ;;  %v100_v59 = vrot.slane %v99_v57, 2 }
  0x20   :  { %v84_v60 = vrot.slane %v83_v58, 1  ;;  %v101_v61 = vadd.f32 %v100_v59, %v99_v57 }
  0x22   :  { %v85_v62 = vadd.f32 %v84_v60, %v83_v58  ;;  %v102_v63 = vrot.slane %v101_v61, 1 }
  0x24   :  { %v86_v0 = vmul.f32 0.035714287, %v85_v62  ;;  %v103_v5 = vadd.f32 %v102_v63, %v101_v61 }
  0x26   :  { %v104_v6 = vmul.f32 0.035714287, %v103_v5  ;;  %v105_v7 = vmul.f32 %v86_v0, %v86_v0  ;;  %v110_v14 = vsub.f32 %v67_v33, %v86_v0  ;;  %v111_v16 = vsub.f32 %v68_v31, %v86_v0 }
  0x27   :  { %v112_v17 = vsub.f32 %v69_v34, %v86_v0  ;;  %v113_v18 = vsub.f32 %v70_v32, %v86_v0  ;;  %v171_v32 = vrot.slane %v934_v22, %v170_v21 }
  0x28   :  { %v106_v8 = vsub.f32 %v104_v6, %v105_v7 }
  0x2a   :  { %v107_v9 = vadd.f32 1e-05, %v106_v8 }
  0x2c   :  { %784 = vrsqrt.f32 %v107_v9 }
  0x39   :  { %v785_v13 = vpop.eup %784 }
  0x3a   :  { %v109_v15 = vmul.f32 %v785_v13, %v881_v2  ;;  %v145_v2 = vrot.slane %v934_v22, %v887_v4 }
  0x3c   :  { %v117_v19 = vrot.slane %v109_v15, %v921_v10 }
  0x3e   :  { %v118_v23 = vmul.f32 %v117_v19, %v110_v14  ;;  %v119_v24 = vmul.f32 %v117_v19, %v111_v16  ;;  %v120_v25 = vmul.f32 %v117_v19, %v112_v17  ;;  %v121_v26 = vmul.f32 %v117_v19, %v113_v18 }
  0x40   :  { %v126_v28 = vadd.f32 %v125_v20, %v118_v23  ;;  %v127_v29 = vadd.f32 %v125_v20, %v119_v24  ;;  %v128_v30 = vadd.f32 %v125_v20, %v120_v25  ;;  %v129_v31 = vadd.f32 %v125_v20, %v121_v26 }
  0x42   :  { %v130_v33 = vmax.f32 %v126_v28, 0.0  ;;  %v131_v34 = vmax.f32 %v127_v29, 0.0  ;;  %v132_v35 = vmax.f32 %v128_v30, 0.0  ;;  %v133_v36 = vmax.f32 %v129_v31, 0.0 }
  0x44   :  { %v138_v38 = vmul.f32 %v137_v27, %v130_v33  ;;  %v139_v39 = vmul.f32 %v137_v27, %v131_v34  ;;  %v140_v40 = vmul.f32 %v137_v27, %v132_v35  ;;  %v141_v41 = vmul.f32 %v137_v27, %v133_v36 }
  0x45   :  { %v146_v42 = vmul.f32 %v145_v2, %v130_v33  ;;  %v147_v43 = vmul.f32 %v145_v2, %v131_v34  ;;  %v148_v44 = vmul.f32 %v145_v2, %v132_v35  ;;  %v149_v45 = vmul.f32 %v145_v2, %v133_v36 }
  0x46   :  { %v172_v46 = vmul.f32 %v171_v32, %v130_v33  ;;  %v173_v47 = vmul.f32 %v171_v32, %v131_v34  ;;  %v174_v48 = vmul.f32 %v171_v32, %v132_v35  ;;  %v175_v49 = vmul.f32 %v171_v32, %v133_v36  ;;  %v960_v35 = vld [vmem:[%s1099_s2 + $0x68] sm:$0x1f] }
  0x47   :  { %v154_v50 = vrot.slane %v146_v42, 1  ;;  %v155_v51 = vrot.slane %v147_v43, 1  ;;  %v157_v52 = vrot.slane %v148_v44, 1  ;;  %v158_v53 = vrot.slane %v149_v45, 1 }
  0x48   :  { %v181_v54 = vrot.slane %v172_v46, 2  ;;  %v182_v55 = vrot.slane %v173_v47, 2  ;;  %v184_v56 = vrot.slane %v174_v48, 2  ;;  %v185_v57 = vrot.slane %v175_v49, 2 }
  0x49   :  { %v156_v58 = vsel %vm48_vm0, %v154_v50, %v155_v51  ;;  %v159_v59 = vsel %vm48_vm0, %v157_v52, %v158_v53  ;;  %v165_v60 = vadd.f32 %v155_v51, %v139_v39  ;;  %v167_v61 = vadd.f32 %v158_v53, %v141_v41  ;;  %v504_v39 = vld [vmem:[%s1099_s2 + $0x60] sm:$0xff] }
  0x4a   :  { %v164_v62 = vadd.f32 %v156_v58, %v138_v38  ;;  %v166_v63 = vadd.f32 %v159_v59, %v140_v40  ;;  %v183_v0 = vsel %vm180_vm3, %v181_v54, %v182_v55  ;;  %v186_v5 = vsel %vm180_vm3, %v184_v56, %v185_v57 }
  0x4b   :  { %v192_v6 = vadd.f32 %v182_v55, %v165_v60  ;;  %v194_v7 = vadd.f32 %v185_v57, %v167_v61  ;;  %v834_v38 = vmov 0.0  }
  0x4c   :  { %v191_v8 = vadd.f32 %v183_v0, %v164_v62  ;;  %v193_v9 = vadd.f32 %v186_v5, %v166_v63  ;;  %730 = vmatprep.subr.mxu0 %v834_v38  ;;  %761 = vmatprep.subr.mxu1 %v834_v38  ;;  %v256_v63 = vrot.slane %v934_v22, %v924_v12  ;;  %v977_v0 = vld [vmem:[%s1098_s1 + $0x10] sm:$0x7f] }
  0x4d   :  { %v200_v13 = vadd.f32 %v198_v37, %v192_v6  ;;  %v202_v14 = vadd.f32 %v198_v37, %v194_v7  ;;  %731 = vmatpush3.msk.msra.mxu0 %vm514_vm5, %v960_v35  ;;  %vm463_vm5 = vcmask 588261  }
  0x4e   :  { %v199_v15 = vadd.f32 %v198_v37, %v191_v8  ;;  %v201_v16 = vadd.f32 %v198_v37, %v193_v9  ;;  %732 = vmatprep.subr.mxu0 %v834_v38  ;;  %v268_v9 = vrot.slane %v977_v0, %v884_v3 }
  0x4f   :  { %v205_v17 = vsel %vm204_vm4, %v200_v13, 0.0  ;;  %v219_v18 = vmul.f32 %v200_v13, %v200_v13  ;;  %v221_v19 = vmul.f32 %v202_v14, %v202_v14  ;;  %v209_v28 = vsel %vm204_vm4, %v202_v14, 0.0  ;;  %733 = vmatpush3.msra.mxu0 %v504_v39 }
  0x50   :  { %v203_v20 = vsel %vm71_vm2, %v199_v15, 0.0  ;;  %v207_v23 = vsel %vm71_vm2, %v201_v16, 0.0  ;;  %v218_v24 = vmul.f32 %v199_v15, %v199_v15  ;;  %v220_v25 = vmul.f32 %v201_v16, %v201_v16  ;;  %734 = vmatprep.subr.mxu0 %v834_v38 }
  0x51   :  { %v206_v26 = vadd.f32 %v205_v17, %v203_v20  ;;  %v223_v27 = vsel %vm204_vm4, %v219_v18, 0.0  ;;  %v227_v32 = vsel %vm204_vm4, %v221_v19, 0.0  ;;  %v302_v18 = vrot.slane %v977_v0, %v170_v21 }
  0x52   :  { %v222_v29 = vsel %vm71_vm2, %v218_v24, 0.0  ;;  %v225_v30 = vsel %vm71_vm2, %v220_v25, 0.0  ;;  %vm456_vm4 = vcmask 488836  }
  0x53   :  { %v208_v31 = vadd.f32 %v207_v23, %v206_v26  ;;  %v224_v2 = vadd.f32 %v223_v27, %v222_v29 }
  0x55   :  { %v210_v33 = vadd.f32 %v209_v28, %v208_v31  ;;  %v226_v34 = vadd.f32 %v225_v30, %v224_v2 }
  0x57   :  { %v211_v36 = vrot.slane %v210_v33, 4  ;;  %v228_v37 = vadd.f32 %v227_v32, %v226_v34 }
  0x59   :  { %v212_v40 = vadd.f32 %v211_v36, %v210_v33  ;;  %v229_v41 = vrot.slane %v228_v37, 4 }
  0x5b   :  { %v213_v42 = vrot.slane %v212_v40, 2  ;;  %v230_v43 = vadd.f32 %v229_v41, %v228_v37 }
  0x5d   :  { %v214_v44 = vadd.f32 %v213_v42, %v212_v40  ;;  %v231_v45 = vrot.slane %v230_v43, 2 }
  0x5f   :  { %v215_v46 = vrot.slane %v214_v44, 1  ;;  %v232_v47 = vadd.f32 %v231_v45, %v230_v43 }
  0x61   :  { %v216_v48 = vadd.f32 %v215_v46, %v214_v44  ;;  %v233_v49 = vrot.slane %v232_v47, 1 }
  0x63   :  { %v217_v50 = vmul.f32 0.041666668, %v216_v48  ;;  %v234_v51 = vadd.f32 %v233_v49, %v232_v47 }
  0x65   :  { %v235_v52 = vmul.f32 0.041666668, %v234_v51  ;;  %v236_v53 = vmul.f32 %v217_v50, %v217_v50  ;;  %v241_v57 = vsub.f32 %v199_v15, %v217_v50  ;;  %v242_v59 = vsub.f32 %v200_v13, %v217_v50 }
  0x66   :  { %v243_v60 = vsub.f32 %v201_v16, %v217_v50  ;;  %v244_v61 = vsub.f32 %v202_v14, %v217_v50  ;;  %v327_v13 = vsub.s32 3, %v876_v1 }
  0x67   :  { %v237_v54 = vsub.f32 %v235_v52, %v236_v53 }
  0x68   :  { %v328_v25 = vrot.slane %v977_v0, %v327_v13 }
  0x69   :  { %v238_v55 = vadd.f32 1e-05, %v237_v54 }
  0x6b   :  { %786 = vrsqrt.f32 %v238_v55 }
  0x78   :  { %v787_v56 = vpop.eup %786 }
  0x79   :  { %v240_v58 = vmul.f32 %v787_v56, %v934_v22  ;;  %v276_v22 = vrot.slane %v977_v0, %v887_v4 }
  0x7b   :  { %v248_v62 = vrot.slane %v240_v58, %v921_v10 }
  0x7d   :  { %v249_v5 = vmul.f32 %v248_v62, %v241_v57  ;;  %v250_v6 = vmul.f32 %v248_v62, %v242_v59  ;;  %v251_v7 = vmul.f32 %v248_v62, %v243_v60  ;;  %v252_v8 = vmul.f32 %v248_v62, %v244_v61 }
  0x7e   :  { %v355_v61 = vrot.slane %v977_v0, %v906_v11 }
  0x7f   :  { %v257_v14 = vadd.f32 %v256_v63, %v249_v5  ;;  %v258_v15 = vadd.f32 %v256_v63, %v250_v6  ;;  %v259_v16 = vadd.f32 %v256_v63, %v251_v7  ;;  %v260_v17 = vadd.f32 %v256_v63, %v252_v8 }
  0x81   :  { %v261_v19 = vmax.f32 %v257_v14, 0.0  ;;  %v262_v20 = vmax.f32 %v258_v15, 0.0  ;;  %v263_v23 = vmax.f32 %v259_v16, 0.0  ;;  %v264_v24 = vmax.f32 %v260_v17, 0.0 }
  0x83   :  { %v269_v3 = vmul.f32 %v268_v9, %v261_v19  ;;  %v270_v26 = vmul.f32 %v268_v9, %v262_v20  ;;  %v271_v27 = vmul.f32 %v268_v9, %v263_v23  ;;  %v272_v28 = vmul.f32 %v268_v9, %v264_v24 }
  0x84   :  { %v277_v29 = vmul.f32 %v276_v22, %v261_v19  ;;  %v278_v30 = vmul.f32 %v276_v22, %v262_v20  ;;  %v279_v31 = vmul.f32 %v276_v22, %v263_v23  ;;  %v280_v2 = vmul.f32 %v276_v22, %v264_v24 }
  0x85   :  { %v303_v4 = vmul.f32 %v302_v18, %v261_v19  ;;  %v304_v32 = vmul.f32 %v302_v18, %v262_v20  ;;  %v305_v1 = vmul.f32 %v302_v18, %v263_v23  ;;  %v306_v33 = vmul.f32 %v302_v18, %v264_v24 }
  0x86   :  { %v285_v21 = vrot.slane %v277_v29, 1  ;;  %v286_v34 = vrot.slane %v278_v30, 1  ;;  %v288_v36 = vrot.slane %v279_v31, 1  ;;  %v289_v37 = vrot.slane %v280_v2, 1 }
  0x87   :  { %v311_v39 = vrot.slane %v303_v4, 2  ;;  %v312_v40 = vrot.slane %v304_v32, 2  ;;  %v314_v41 = vrot.slane %v305_v1, 2  ;;  %v315_v42 = vrot.slane %v306_v33, 2 }
  0x88   :  { %v287_v43 = vsel %vm48_vm0, %v285_v21, %v286_v34  ;;  %v290_v44 = vsel %vm48_vm0, %v288_v36, %v289_v37  ;;  %v296_v45 = vadd.f32 %v286_v34, %v270_v26  ;;  %v298_v46 = vadd.f32 %v289_v37, %v272_v28 }
  0x89   :  { %v295_v47 = vadd.f32 %v287_v43, %v269_v3  ;;  %v297_v48 = vadd.f32 %v290_v44, %v271_v27  ;;  %v313_v49 = vsel %vm180_vm3, %v311_v39, %v312_v40  ;;  %v316_v50 = vsel %vm180_vm3, %v314_v41, %v315_v42 }
  0x8a   :  { %v322_v51 = vadd.f32 %v312_v40, %v296_v45  ;;  %v324_v52 = vadd.f32 %v315_v42, %v298_v46  ;;  %v329_v53 = vmul.f32 %v328_v25, %v261_v19  ;;  %v330_v54 = vmul.f32 %v328_v25, %v262_v20 }
  0x8b   :  { %v321_v55 = vadd.f32 %v313_v49, %v295_v47  ;;  %v323_v56 = vadd.f32 %v316_v50, %v297_v48  ;;  %v331_v57 = vmul.f32 %v328_v25, %v263_v23  ;;  %v332_v58 = vmul.f32 %v328_v25, %v264_v24 }
  0x8c   :  { %v338_v59 = vrot.slane %v329_v53, 3  ;;  %v339_v60 = vrot.slane %v330_v54, 3  ;;  %vm838_vm0 = vmmov 0   ;;  %vm449_vm3 = vcmask 389411  }
  0x8d   :  { %v341_v62 = vrot.slane %v331_v57, 3  ;;  %v342_v63 = vrot.slane %v332_v58, 3  ;;  %v502_v57 = vld [vmem:[%s1099_s2 + $0x50] sm:$0xff]  ;;  %758 = vmatprep.mubr.msk.f32.mxu0 %vm838_vm0, %v834_v38  ;;  %769 = vmatprep.mubr.msk.f32.mxu1 %vm838_vm0, %v834_v38 }
  0x8e   :  { %v340_v5 = vsel %vm337_vm6, %v338_v59, %v339_v60  ;;  %v349_v6 = vadd.f32 %v339_v60, %v322_v51  ;;  %v501_v59 = vld [vmem:[%s1099_s2 + $0x48] sm:$0xff] }
  0x8f   :  { %v343_v7 = vsel %vm337_vm6, %v341_v62, %v342_v63  ;;  %v348_v8 = vadd.f32 %v340_v5, %v321_v55  ;;  %v351_v9 = vadd.f32 %v342_v63, %v324_v52  ;;  %v503_v55 = vld [vmem:[%s1099_s2 + $0x58] sm:$0xff]  ;;  %v500_v62 = vld [vmem:[%s1099_s2 + $0x40] sm:$0xff]  ;;  %vm470_vm6 = vcmask 687686  }
  0x90   :  { %v350_v13 = vadd.f32 %v343_v7, %v323_v56  ;;  %v357_v14 = vadd.f32 %v355_v61, %v349_v6  ;;  %735 = vmatpush3.msra.mxu0 %v503_v55 }
  0x91   :  { %v356_v15 = vadd.f32 %v355_v61, %v348_v8  ;;  %v359_v16 = vadd.f32 %v355_v61, %v351_v9  ;;  %736 = vmatprep.subr.mxu0 %v834_v38 }
  0x92   :  { %v358_v17 = vadd.f32 %v355_v61, %v350_v13  ;;  %v362_v22 = vsel %vm361_vm7, %v357_v14, 0.0  ;;  %v376_v18 = vmul.f32 %v357_v14, %v357_v14  ;;  %737 = vmatpush3.msra.mxu0 %v502_v57  ;;  %v413_v61 = vrot.slane %v977_v0, %v924_v12  ;;  %v498_v13 = vld [vmem:[%s1099_s2 + $0x30] sm:$0xff] }
  0x93   :  { %v360_v19 = vsel %vm71_vm2, %v356_v15, 0.0  ;;  %v375_v20 = vmul.f32 %v356_v15, %v356_v15  ;;  %v378_v23 = vmul.f32 %v359_v16, %v359_v16  ;;  %v366_v27 = vsel %vm361_vm7, %v359_v16, 0.0  ;;  %738 = vmatprep.subr.mxu0 %v834_v38 }
  0x94   :  { %v363_v24 = vadd.f32 %v362_v22, %v360_v19  ;;  %v364_v25 = vsel %vm71_vm2, %v358_v17, 0.0  ;;  %v377_v3 = vmul.f32 %v358_v17, %v358_v17  ;;  %v380_v26 = vsel %vm361_vm7, %v376_v18, 0.0  ;;  %739 = vmatpush3.msra.mxu0 %v501_v59  ;;  %v497_v22 = vld [vmem:[%s1099_s2 + $0x28] sm:$0xff] }
  0x95   :  { %v379_v28 = vsel %vm71_vm2, %v375_v20, 0.0  ;;  %v384_v2 = vsel %vm361_vm7, %v378_v23, 0.0  ;;  %740 = vmatprep.subr.mxu0 %v834_v38  ;;  %v496_v20 = vld [vmem:[%s1099_s2 + $0x20] sm:$0xff]  ;;  %vm478_vm7 = vcmask 786087  }
  0x96   :  { %v365_v29 = vadd.f32 %v364_v25, %v363_v24  ;;  %v381_v30 = vadd.f32 %v380_v26, %v379_v28  ;;  %v382_v31 = vsel %vm71_vm2, %v377_v3, 0.0  ;;  %741 = vmatpush3.msra.mxu0 %v500_v62  ;;  %vm442_vm2 = vcmask 289986  }
  0x97   :  { %742 = vmatprep.subr.mxu0 %v834_v38 }
  0x98   :  { %v367_v4 = vadd.f32 %v366_v27, %v365_v29  ;;  %v383_v32 = vadd.f32 %v382_v31, %v381_v30  ;;  %v495_v30 = vld [vmem:[%s1099_s2 + $0x18] sm:$0xff]  ;;  %v494_v31 = vld [vmem:[%s1099_s2 + $0x10] sm:$0xff] }
  0x9a   :  { %v368_v1 = vrot.slane %v367_v4, 4  ;;  %v385_v33 = vadd.f32 %v384_v2, %v383_v32  ;;  %v493_v2 = vld [vmem:[%s1099_s2 + $0x8] sm:$0xff]  ;;  %v591_v32 = vld [vmem:[%s1100_s3 + $0x18] sm:$0xff] }
  0x9b   :  { %762 = vmatpush3.msra.mxu1 %v591_v32 }
  0x9c   :  { %v369_v21 = vadd.f32 %v368_v1, %v367_v4  ;;  %v386_v34 = vrot.slane %v385_v33, 4  ;;  %v492_v4 = vld [vmem:[%s1099_s2] sm:$0xff]  ;;  %v590_v1 = vld [vmem:[%s1100_s3 + $0x10] sm:$0xff]  ;;  %763 = vmatprep.subr.mxu1 %v834_v38 }
  0x9d   :  { %764 = vmatpush3.msra.mxu1 %v590_v1 }
  0x9e   :  { %v370_v36 = vrot.slane %v369_v21, 2  ;;  %v387_v37 = vadd.f32 %v386_v34, %v385_v33  ;;  %765 = vmatprep.subr.mxu1 %v834_v38 }
  0xa0   :  { %v371_v39 = vadd.f32 %v370_v36, %v369_v21  ;;  %v388_v40 = vrot.slane %v387_v37, 2 }
  0xa2   :  { %v372_v41 = vrot.slane %v371_v39, 1  ;;  %v389_v42 = vadd.f32 %v388_v40, %v387_v37 }
  0xa4   :  { %v373_v43 = vadd.f32 %v372_v41, %v371_v39  ;;  %v390_v44 = vrot.slane %v389_v42, 1 }
  0xa6   :  { %v374_v45 = vmul.f32 0.055555556, %v373_v43  ;;  %v391_v46 = vadd.f32 %v390_v44, %v389_v42  ;;  %v589_v44 = vld [vmem:[%s1100_s3 + $0x8] sm:$0xff] }
  0xa7   :  { %766 = vmatpush3.msra.mxu1 %v589_v44 }
  0xa8   :  { %v392_v47 = vmul.f32 0.055555556, %v391_v46  ;;  %v393_v48 = vmul.f32 %v374_v45, %v374_v45  ;;  %v398_v49 = vsub.f32 %v356_v15, %v374_v45  ;;  %v400_v50 = vsub.f32 %v358_v17, %v374_v45  ;;  %767 = vmatprep.subr.mxu1 %v834_v38 }
  0xa9   :  { %v399_v51 = vsub.f32 %v357_v14, %v374_v45  ;;  %v401_v52 = vsub.f32 %v359_v16, %v374_v45  ;;  %v588_v45 = vld [vmem:[%s1100_s3] sm:$0xff]  ;;  %v509_v46 = vrot.slane %v960_v35, %v906_v11 }
  0xaa   :  { %v394_v53 = vsub.f32 %v392_v47, %v393_v48  ;;  %768 = vmatpush3.msra.mxu1 %v588_v45 }
  0xac   :  { %v395_v54 = vadd.f32 1e-05, %v394_v53 }
  0xae   :  { %788 = vrsqrt.f32 %v395_v54 }
  0xbb   :  { %v789_v56 = vpop.eup %788 }
  0xbc   :  { %v397_v58 = vmul.f32 %v789_v56, %v977_v0 }
  0xbe   :  { %v405_v60 = vrot.slane %v397_v58, %v921_v10  ;;  %v499_v10 = vld [vmem:[%s1099_s2 + $0x38] sm:$0xff]  ;;  %s843_s2 = smov 96  }
  0xbf   :  { %743 = vmatpush3.msra.mxu0 %v499_v10 }
  0xc0   :  { %v406_v63 = vmul.f32 %v405_v60, %v398_v49  ;;  %v408_v5 = vmul.f32 %v405_v60, %v400_v50  ;;  %v407_v6 = vmul.f32 %v405_v60, %v399_v51  ;;  %v409_v7 = vmul.f32 %v405_v60, %v401_v52  ;;  %744 = vmatprep.subr.mxu0 %v834_v38  ;;  %v708_v50 = vld [vmem:[%s1100_s3 + $0x20] ss:$0 sm:$0xff] }
  0xc1   :  { %745 = vmatpush3.msra.mxu0 %v498_v13 }
  0xc2   :  { %v414_v8 = vadd.f32 %v413_v61, %v406_v63  ;;  %v416_v12 = vadd.f32 %v413_v61, %v408_v5  ;;  %v415_v0 = vadd.f32 %v413_v61, %v407_v6  ;;  %v417_v9 = vadd.f32 %v413_v61, %v409_v7  ;;  %746 = vmatprep.subr.mxu0 %v834_v38 }
  0xc3   :  { %747 = vmatpush3.msra.mxu0 %v497_v22 }
  0xc4   :  { %v418_v14 = vmax.f32 %v414_v8, 0.0  ;;  %v420_v15 = vmax.f32 %v416_v12, 0.0  ;;  %v421_v16 = vmax.f32 %v417_v9, 0.0  ;;  %v419_v17 = vmax.f32 %v415_v0, 0.0  ;;  %748 = vmatprep.subr.mxu0 %v834_v38 }
  0xc5   :  { %749 = vmatpush3.msra.mxu0 %v496_v20 }
  0xc6   :  { %472 = vrot.lane.b32.xlu0 %v418_v14, %s835_s23  ;;  %v424_v18 = vrot.slane %v420_v15, 7  ;;  %v484_v19 = vrot.slane %v421_v16, 7  ;;  %750 = vmatprep.subr.mxu0 %v834_v38 }
  0xc7   :  { %751 = vmatpush3.msra.mxu0 %v495_v30 }
  0xc8   :  { %v445_v23 = vsel %vm444_vm8, %v424_v18, %v418_v14  ;;  %v431_v24 = vsel %vm430_vm9, %v424_v18, %v418_v14  ;;  %v452_v25 = vsel %vm451_vm10, %v424_v18, %v418_v14  ;;  %v438_v3 = vsel %vm437_vm11, %v424_v18, %v418_v14  ;;  %752 = vmatprep.subr.mxu0 %v834_v38 }
  0xc9   :  { %446 = vrot.lane.b32.xlu1 %v445_v23, %s836_s26  ;;  %v466_v26 = vsel %vm465_vm12, %v424_v18, %v418_v14  ;;  %v459_v27 = vsel %vm458_vm13, %v424_v18, %v418_v14  ;;  %v485_v28 = vsel %vm425_vm14, %v484_v19, %v419_v17  ;;  %v426_v29 = vsel %vm425_vm14, %v424_v18, %v418_v14 }
  0xca   :  { %432 = vrot.lane.b32.xlu0 %v431_v24, %s837_s28  ;;  %429 = vst.msk [vmem:[#allocation2] sm:$0x3] %vm428_vm15, %v426_v29  ;;  %753 = vmatpush3.msra.mxu0 %v494_v31  ;;  %vm480_vm8 = vcmask 778912   ;;  %vm489_vm9 = vcmask 878336   ;;  %vm510_vm10 = vcmask 883712   ;;  %vm597_vm11 = vcmask 261120  }
  0xcb   :  { %754 = vmatprep.subr.mxu0 %v834_v38  ;;  %vm671_vm12 = vcmask 254976  }
  0xcc   :  { %755 = vmatpush3.msra.mxu0 %v493_v2 }
  0xcd   :  { %453 = vrot.lane.b32.xlu1 %v452_v25, %s839_s8  ;;  %756 = vmatprep.subr.mxu0 %v834_v38 }
  0xce   :  { %439 = vrot.lane.b32.xlu0 %v438_v3, %s840_s9  ;;  %757 = vmatpush3.msra.mxu0 %v492_v4 }
  0xd1   :  { %467 = vrot.lane.b32.xlu1 %v466_v26, %s841_s11 }
  0xd2   :  { %460 = vrot.lane.b32.xlu0 %v459_v27, %s842_s16 }
  0xd5   :  { %474 = vrot.lane.b32.xlu1 %v424_v18, %s835_s23  ;;  %s844_s23 = smov [#allocation3]  }
  0xd6   :  { %486 = vrot.lane.b32.xlu0 %v485_v28, %s843_s2  ;;  %s684_s24 = sshll.u32 %s844_s23, 4  ;;  %s685_s24 = int_to_ptr.vmem [resolvable:$true] %s684_s24 }
  0xd7   :  { %s790_s25 = scalar_lea.vmem %s685_s24, 32  ;;  %p795_p1 = scmp.lt.s32.totalorder %s685_s24, %s685_s24 }
  0xd8   :  { %p791_p0 = scmp.ne.s32.totalorder %s685_s24, %s790_s25  ;;  %p796_p2 = scmp.lt.s32.totalorder %s790_s25, %s790_s25 }
  0xda   :  { %p797_p3 = por %p796_p2, %p795_p1 }
  0xdc   :  { %p798_p4 = pnand %p797_p3, %p791_p0 }
 0x138   :  { %v473_v33 = vpop.permute.xlu0 %472 }
 0x13b   :  { %v447_v21 = vpop.permute.xlu1 %446 }
 0x13c   :  { %v433_v34 = vpop.permute.xlu0 %432 }
 0x13d   :  { %436 = vst.msk [vmem:[#allocation2 - $0x1] sm:$0x6] %vm435_vm1, %v433_v34 }
 0x13f   :  { %v454_v36 = vpop.permute.xlu1 %453 }
 0x140   :  { %v440_v37 = vpop.permute.xlu0 %439 }
 0x141   :  { %443 = vst.msk [vmem:[#allocation2 - $0x2] sm:$0xc] %vm442_vm2, %v440_v37 }
 0x142   :  { %450 = vst.msk [vmem:[#allocation2 - $0x3] sm:$0x18] %vm449_vm3, %v447_v21 }
 0x143   :  { %v468_v39 = vpop.permute.xlu1 %467  ;;  %457 = vst.msk [vmem:[#allocation2 - $0x4] sm:$0x30] %vm456_vm4, %v454_v36 }
 0x144   :  { %v461_v40 = vpop.permute.xlu0 %460 }
 0x145   :  { %464 = vst.msk [vmem:[#allocation2 - $0x5] sm:$0x60] %vm463_vm5, %v461_v40 }
 0x146   :  { %471 = vst.msk [vmem:[#allocation2 - $0x6] sm:$0xc0] %vm470_vm6, %v468_v39 }
 0x147   :  { %v475_v41 = vpop.permute.xlu1 %474  ;;  %479 = vst.msk [vmem:[#allocation2 - $0x7] sm:$0x80] %vm478_vm7, %v473_v33 }
 0x148   :  { %481 = vst.msk [vmem:[#allocation2 + $0x1] sm:$0x1] %vm480_vm8, %v475_v41  ;;  %v487_v42 = vpop.permute.xlu0 %486 }
 0x149   :  { %490 = vst.msk [vmem:[#allocation2] sm:$0x3] %vm489_vm9, %v487_v42 }
 0x150   :  { %v491_v43 = vld [vmem:[#allocation2] sm:$0x3] }
 0x151   :  { %759 = vmatmul.mubr.msk.f32.vlgmr.msra.gmra.mxu0 %vm510_vm10, %v491_v43 }
 0x211   :  { %v584_v47 = vpop.f32.mrf.mxu0 }
 0x212   :  { %v585_v48 = vadd.f32 %v584_v47, %v509_v46 }
 0x213   :  { %v760_v49 = vpop.f32.mrf.mxu0 }
 0x214   :  { %770 = vmatmul.mubr.msk.f32.vlgmr.msra.gmra.mxu1 %vm597_vm11, %v585_v48 }
 0x2d4   :  { %v667_v38 = vpop.f32.mrf.mxu1 }
 0x2d5   :  { %v668_v51 = vadd.f32 %v708_v50, %v667_v38 }
 0x2d6   :  { %v771_v52 = vpop.f32.mrf.mxu1 }
 0x2d7   :  { %674 = vrot.lane.b32.xlu1 %v668_v51, %s843_s2  ;;  %672 = vst.msk [vmem:[#allocation3] sm:$0x3] %vm671_vm12, %v668_v51 }
 0x2d8   :  { %801 = shalt.err (!%p798_p4)
}
 0x2d9   :  { %687 = dma.vmem_to_hbm [thread:$0]  %s685_s24, 32, %s1101_s4, [#allocation4]  }
 0x2da   :  { %s845_s27 = smov [#allocation5]  }
 0x2db   :  { %s694_s0 = sshll.u32 %s845_s27, 4  ;;  %s695_s0 = int_to_ptr.vmem [resolvable:$true] %s694_s0 }
 0x2dc   :  { %s810_s28 = scalar_lea.vmem %s695_s0, 32  ;;  %p815_p6 = scmp.lt.s32.totalorder %s695_s0, %s695_s0 }
 0x2dd   :  { %p811_p5 = scmp.ne.s32.totalorder %s695_s0, %s810_s28  ;;  %p816_p7 = scmp.lt.s32.totalorder %s810_s28, %s810_s28 }
 0x2df   :  { %p817_p8 = por %p816_p7, %p815_p6 }
 0x2e1   :  { %p818_p9 = pnand %p817_p8, %p811_p5 }
 0x349   :  { %v675_v11 = vpop.permute.xlu1 %674 }
 0x34a   :  { %677 = vst.msk [vmem:[#allocation5] sm:$0x3] %vm671_vm12, %v675_v11 }
 0x34b   :  { %821 = shalt.err (!%p818_p9)
}
 0x34c   :  { %697 = dma.vmem_to_hbm [thread:$0]  %s695_s0, 32, %s1102_s5, [#allocation6]  }
 0x34d   :  { %830 = dma.done.wait [#allocation4], 32  }
 0x34e   :  { %831 = vsyncadd [#allocation4], 4294967264 }
 0x34f   :  { %832 = dma.done.wait [#allocation6], 32  }
 0x350   :  { %833 = vsyncadd [#allocation6], 4294967264 }
 0x351   :  { %704 = vsyncpa [#allocation4], 1 }
 0x352   :  { %705 = vsyncpa [#allocation6], 1 }

</bundles_post_ra>
